<compile_context>
chip_gen: v5e
topology: v5e:2x2
jax: 0.10.0
libtpu: 0.0.40
codegen_flags: <defaults>
</compile_context>

<pallas_src>
import jax
import jax.numpy as jnp
from jax.experimental import pallas as pl
from jax.experimental.pallas import tpu as pltpu


def _round_up(x, m):
    return ((x + m - 1) // m) * m


def _pad_to(a, shape):
    pads = [(0, t - s) for s, t in zip(a.shape, shape)]
    return jnp.pad(a, pads)


def qagent_fwd_kernel(x_ref, w1_ref, b1_ref, wcat_ref, bcat_ref, q_ref, act_ref):
    # Hidden layer: tanh(x @ W1 + b1)  -- matmul on MXU, tanh on EUP.
    h = jnp.tanh(
        jnp.dot(x_ref[...], w1_ref[...], preferred_element_type=jnp.float32)
        + b1_ref[...]
    )
    # One fused matmul produces [Q-values | action-diff logits] side by side.
    qa = (
        jnp.dot(h, wcat_ref[...], preferred_element_type=jnp.float32)
        + bcat_ref[...]
    )
    out_pad = q_ref.shape[-1]
    # Q-values (lane-dense padded output, wrapper slices back to n_out).
    q_ref[...] = qa[:, :out_pad].astype(q_ref.dtype)
    # Fused greedy action: diff[:, g] = Q[:, 2g+1] - Q[:, 2g]; action = 1 iff
    # the "up" Q strictly exceeds the "down" Q (matches argmax tie-breaking,
    # which picks the first index on ties).
    d = qa[:, out_pad:]
    act_ref[...] = (d > 0).astype(jnp.int32)


def qagent_forward(obs, w1, b1, w2, b2, *, tile_b=512):
    """QAgent forward pass (+ greedy actions) in one batched Pallas kernel.

    obs: (B, obs_size) or (obs_size,) -- anything castable to float32
    w1 : (obs_size, hidden), b1: (1, hidden)
    w2 : (hidden, n_out),    b2: (1, n_out)      with n_out = 2 * num_gen
    returns: (q_values (B, n_out) float32, actions (B, num_gen) int32)
    """
    x = jnp.asarray(obs, dtype=jnp.float32)
    squeeze = x.ndim == 1
    if squeeze:
        x = x[None, :]

    B, obs_size = x.shape
    hidden = w1.shape[1]
    n_out = w2.shape[1]
    num_gen = n_out // 2

    # Padded, lane/sublane-aligned feature dims.
    OBS_PAD = _round_up(obs_size, 8)
    HID_PAD = _round_up(hidden, 128)
    OUT_PAD = _round_up(n_out, 128)
    ACT_PAD = _round_up(num_gen, 128)
    CAT_PAD = OUT_PAD + ACT_PAD

    # Batch tiling (rows per grid step).
    TB = _round_up(min(tile_b, _round_up(B, 8)), 8)
    B_pad = _round_up(B, TB)
    grid = (B_pad // TB,)

    # Layout plumbing (zero-padding is exact: padded hidden units see zero
    # weight and zero bias -> tanh(0)=0 -> contribute nothing downstream).
    xp = _pad_to(x, (B_pad, OBS_PAD))
    w1p = _pad_to(w1, (OBS_PAD, HID_PAD))
    b1p = _pad_to(b1, (1, HID_PAD))
    # Concatenated second-layer weights: [ W2 | W2_odd - W2_even ], padded.
    w2p = _pad_to(w2, (HID_PAD, OUT_PAD))
    b2p = _pad_to(b2, (1, OUT_PAD))
    w2d = _pad_to(w2[:, 1::2] - w2[:, 0::2], (HID_PAD, ACT_PAD))
    b2d = _pad_to(b2[:, 1::2] - b2[:, 0::2], (1, ACT_PAD))
    wcat = jnp.concatenate([w2p, w2d], axis=1)       # (HID_PAD, CAT_PAD)
    bcat = jnp.concatenate([b2p, b2d], axis=1)       # (1, CAT_PAD)

    q_pad, act_pad = pl.pallas_call(
        qagent_fwd_kernel,
        out_shape=(
            jax.ShapeDtypeStruct((B_pad, OUT_PAD), jnp.float32),
            jax.ShapeDtypeStruct((B_pad, ACT_PAD), jnp.int32),
        ),
        grid=grid,
        in_specs=[
            pl.BlockSpec((TB, OBS_PAD), lambda i: (i, 0)),        # x tile
            pl.BlockSpec((OBS_PAD, HID_PAD), lambda i: (0, 0)),   # W1 (resident)
            pl.BlockSpec((1, HID_PAD), lambda i: (0, 0)),         # b1 (resident)
            pl.BlockSpec((HID_PAD, CAT_PAD), lambda i: (0, 0)),   # [W2 | W2diff]
            pl.BlockSpec((1, CAT_PAD), lambda i: (0, 0)),         # [b2 | b2diff]
        ],
        out_specs=(
            pl.BlockSpec((TB, OUT_PAD), lambda i: (i, 0)),
            pl.BlockSpec((TB, ACT_PAD), lambda i: (i, 0)),
        ),
        compiler_params=pltpu.CompilerParams(
            dimension_semantics=("parallel",),  # shard batch across TCs on v7x
        ),
    )(xp, w1p, b1p, wcat, bcat)

    q = q_pad[:B, :n_out]
    actions = act_pad[:B, :num_gen]
    if squeeze:
        q, actions = q[0], actions[0]
    return q, actions


def init_params(key, obs_size, hidden, n_out):
    """Deterministic init mimicking nn.Linear default (uniform +- 1/sqrt(fan_in))."""
    k1, k2, k3, k4 = jax.random.split(key, 4)
    lim1 = 1.0 / jnp.sqrt(obs_size)
    lim2 = 1.0 / jnp.sqrt(hidden)
    w1 = jax.random.uniform(k1, (obs_size, hidden), jnp.float32, -lim1, lim1)
    b1 = jax.random.uniform(k2, (1, hidden), jnp.float32, -lim1, lim1)
    w2 = jax.random.uniform(k3, (hidden, n_out), jnp.float32, -lim2, lim2)
    b2 = jax.random.uniform(k4, (1, n_out), jnp.float32, -lim2, lim2)
    return w1, b1, w2, b2


if __name__ == "__main__":
    # Env-like sizes: num_gen generators, obs = generator statuses + timestep.
    num_gen = 5
    obs_size = num_gen + 1          # process_observation: status (num_gen) + timestep (1)
    hidden = 32                     # self.num_nodes
    n_out = 2 * num_gen             # self.n_out
    batch = 64                      # small batched evaluation (replay-buffer style)

    key = jax.random.PRNGKey(0)
    k_obs, k_params = jax.random.split(key)

    obs = jax.random.normal(k_obs, (batch, obs_size), dtype=jnp.float32)
    w1, b1, w2, b2 = init_params(k_params, obs_size, hidden, n_out)

    q_values, actions = qagent_forward(obs, w1, b1, w2, b2, tile_b=512)
    q_values = jax.block_until_ready(q_values)
    actions = jax.block_until_ready(actions)

    # Pure-JAX reference check of the forward semantics.
    ref_q = jnp.tanh(obs @ w1 + b1) @ w2 + b2
    assert q_values.shape == (batch, n_out)
    assert actions.shape == (batch, num_gen)
    assert jnp.allclose(q_values, ref_q, atol=1e-4, rtol=1e-4)

    # Fused greedy actions must match argmax over (num_gen, 2) pairs of the
    # kernel's own Q-values (allow fp-level near-ties).
    q_pairs = q_values.reshape(batch, num_gen, 2)
    ref_act = jnp.argmax(q_pairs, axis=-1).astype(jnp.int32)
    near_tie = jnp.abs(q_pairs[..., 1] - q_pairs[..., 0]) < 1e-4
    assert bool(jnp.all((actions == ref_act) | near_tie))

    # Single-observation path, as used by act().
    q1, a1 = qagent_forward(obs[0], w1, b1, w2, b2)
    jax.block_until_ready((q1, a1))
    assert q1.shape == (n_out,) and a1.shape == (num_gen,)
    assert jnp.allclose(q1, ref_q[0], atol=1e-4, rtol=1e-4)

    # TODO(synk): update() (Adam + MSE TD loss) is host/training logic; use JAX
    # autodiff + optax around qagent_forward rather than a Pallas kernel.

    print("KERNEL_OK")
</pallas_src>

<mosaic_0001>
module attributes {stable_mosaic.version = 11 : i64} {
  func.func @qagent_fwd_kernel(%arg0: i32, %arg1: memref<64x8xf32, #tpu.memory_space<vmem>>, %arg2: memref<8x128xf32, #tpu.memory_space<vmem>>, %arg3: memref<1x128xf32, #tpu.memory_space<vmem>>, %arg4: memref<128x256xf32, #tpu.memory_space<vmem>>, %arg5: memref<1x256xf32, #tpu.memory_space<vmem>>, %arg6: memref<64x128xf32, #tpu.memory_space<vmem>>, %arg7: memref<64x128xi32, #tpu.memory_space<vmem>>) attributes {dimension_semantics = [#tpu.dimension_semantics<parallel>], iteration_bounds = array<i64: 1>, scalar_prefetch = 0 : i64, scratch_operands = 0 : i64, tpu.core_type = #tpu.core_type<tc>, window_params = [{transform_indices = @transform_0, window_bounds = array<i64: 64, 8>}, {pipeline_mode = #tpu.pipeline_mode<synchronous>, transform_indices = @transform_1, window_bounds = array<i64: 8, 128>}, {pipeline_mode = #tpu.pipeline_mode<synchronous>, transform_indices = @transform_2, window_bounds = array<i64: 1, 128>}, {pipeline_mode = #tpu.pipeline_mode<synchronous>, transform_indices = @transform_3, window_bounds = array<i64: 128, 256>}, {pipeline_mode = #tpu.pipeline_mode<synchronous>, transform_indices = @transform_4, window_bounds = array<i64: 1, 256>}, {transform_indices = @transform_5, window_bounds = array<i64: 64, 128>}, {transform_indices = @transform_6, window_bounds = array<i64: 64, 128>}]} {
    %c0 = arith.constant 0 : index
    %c0_0 = arith.constant 0 : index
    %0 = vector.load %arg1[%c0, %c0_0] : memref<64x8xf32, #tpu.memory_space<vmem>>, vector<64x8xf32>
    %c0_1 = arith.constant 0 : index
    %c0_2 = arith.constant 0 : index
    %1 = vector.load %arg2[%c0_1, %c0_2] : memref<8x128xf32, #tpu.memory_space<vmem>>, vector<8x128xf32>
    %cst = arith.constant dense<0.000000e+00> : vector<64x128xf32>
    %2 = tpu.matmul %0, %1, %cst {dimension_numbers = #tpu.dot_dimension_numbers<[1], [0], [0], [1], [0, 0, 1, 1], [], []>} : vector<64x8xf32>, vector<8x128xf32>, vector<64x128xf32> -> vector<64x128xf32>
    %c0_3 = arith.constant 0 : index
    %c0_4 = arith.constant 0 : index
    %3 = vector.load %arg3[%c0_3, %c0_4] : memref<1x128xf32, #tpu.memory_space<vmem>>, vector<1x128xf32>
    %4 = vector.broadcast %3 : vector<1x128xf32> to vector<64x128xf32>
    %5 = arith.addf %2, %4 : vector<64x128xf32>
    %6 = math.tanh %5 : vector<64x128xf32>
    %c0_5 = arith.constant 0 : index
    %c0_6 = arith.constant 0 : index
    %7 = vector.load %arg4[%c0_5, %c0_6] : memref<128x256xf32, #tpu.memory_space<vmem>>, vector<128x256xf32>
    %cst_7 = arith.constant dense<0.000000e+00> : vector<64x256xf32>
    %8 = tpu.matmul %6, %7, %cst_7 {dimension_numbers = #tpu.dot_dimension_numbers<[1], [0], [0], [1], [0, 0, 1, 1], [], []>} : vector<64x128xf32>, vector<128x256xf32>, vector<64x256xf32> -> vector<64x256xf32>
    %c0_8 = arith.constant 0 : index
    %c0_9 = arith.constant 0 : index
    %9 = vector.load %arg5[%c0_8, %c0_9] : memref<1x256xf32, #tpu.memory_space<vmem>>, vector<1x256xf32>
    %10 = vector.broadcast %9 : vector<1x256xf32> to vector<64x256xf32>
    %11 = arith.addf %8, %10 : vector<64x256xf32>
    %12 = vector.extract_strided_slice %11 {offsets = [0, 0], sizes = [64, 128], strides = [1, 1]} : vector<64x256xf32> to vector<64x128xf32>
    %c0_10 = arith.constant 0 : index
    %c0_11 = arith.constant 0 : index
    %13 = vector.load %arg6[%c0_10, %c0_11] : memref<64x128xf32, #tpu.memory_space<vmem>>, vector<64x128xf32>
    tpu.vector_store %arg6[%c0_10, %c0_11], %12 {strides = array<i32>} : memref<64x128xf32, #tpu.memory_space<vmem>>, vector<64x128xf32>,
    %14 = vector.extract_strided_slice %11 {offsets = [0, 128], sizes = [64, 128], strides = [1, 1]} : vector<64x256xf32> to vector<64x128xf32>
    %cst_12 = arith.constant 0.000000e+00 : f32
    %15 = vector.broadcast %cst_12 : f32 to vector<64x128xf32>
    %16 = arith.cmpf ogt, %14, %15 : vector<64x128xf32>
    %17 = arith.extui %16 : vector<64x128xi1> to vector<64x128xi32>
    %c0_13 = arith.constant 0 : index
    %c0_14 = arith.constant 0 : index
    %18 = vector.load %arg7[%c0_13, %c0_14] : memref<64x128xi32, #tpu.memory_space<vmem>>, vector<64x128xi32>
    tpu.vector_store %arg7[%c0_13, %c0_14], %17 {strides = array<i32>} : memref<64x128xi32, #tpu.memory_space<vmem>>, vector<64x128xi32>,
    return
  }
  func.func @transform_0(%arg0: i32) -> (i32, i32) {
    %c0_i32 = arith.constant 0 : i32
    %c0_i32_0 = arith.constant 0 : i32
    return %arg0, %c0_i32 : i32, i32
  }
  func.func @transform_1(%arg0: i32) -> (i32, i32) {
    %c0_i32 = arith.constant 0 : i32
    %c0_i32_0 = arith.constant 0 : i32
    %c0_i32_1 = arith.constant 0 : i32
    return %c0_i32, %c0_i32_0 : i32, i32
  }
  func.func @transform_2(%arg0: i32) -> (i32, i32) {
    %c0_i32 = arith.constant 0 : i32
    %c0_i32_0 = arith.constant 0 : i32
    %c0_i32_1 = arith.constant 0 : i32
    return %c0_i32, %c0_i32_0 : i32, i32
  }
  func.func @transform_3(%arg0: i32) -> (i32, i32) {
    %c0_i32 = arith.constant 0 : i32
    %c0_i32_0 = arith.constant 0 : i32
    %c0_i32_1 = arith.constant 0 : i32
    return %c0_i32, %c0_i32_0 : i32, i32
  }
  func.func @transform_4(%arg0: i32) -> (i32, i32) {
    %c0_i32 = arith.constant 0 : i32
    %c0_i32_0 = arith.constant 0 : i32
    %c0_i32_1 = arith.constant 0 : i32
    return %c0_i32, %c0_i32_0 : i32, i32
  }
  func.func @transform_5(%arg0: i32) -> (i32, i32) {
    %c0_i32 = arith.constant 0 : i32
    %c0_i32_0 = arith.constant 0 : i32
    return %arg0, %c0_i32 : i32, i32
  }
  func.func @transform_6(%arg0: i32) -> (i32, i32) {
    %c0_i32 = arith.constant 0 : i32
    %c0_i32_0 = arith.constant 0 : i32
    return %arg0, %c0_i32 : i32, i32
  }
}

</mosaic_0001>

<bundles_post_ra>
// kernel: tpu_custom_call.1
= control target key start
LH: loop header
LB: loop body
LE: loop exit
PB: predicated region body
PF: predicated region fallthrough
CT: control target
= control target key end

     0   :  { %12 = vsyncpa [#allocation3], 0  ;;  %s598_s0 = inlined_call_operand.vmem [shape: f32[64,8], index: 0, kind: input, shape index: {}]   ;;  %s599_s1 = inlined_call_operand.vmem [shape: f32[8,128], index: 1, kind: input, shape index: {}]   ;;  %s600_s2 = inlined_call_operand.vmem [shape: f32[1,128], index: 2, kind: input, shape index: {}]   ;;  %s601_s3 = inlined_call_operand.hbm [shape: f32[128,256], index: 3, kind: input, shape index: {}]   ;;  %s602_s4 = inlined_call_operand.vmem [shape: f32[1,256], index: 4, kind: input, shape index: {}]   ;;  %s603_s5 = inlined_call_operand.hbm [shape: f32[64,128], index: 5, kind: output, shape index: {0}]   ;;  %s604_s6 = inlined_call_operand.hbm [shape: s32[64,128], index: 6, kind: output, shape index: {1}]  }
   0x1   :  { %13 = vsyncpa [#allocation4], 0 }
   0x2   :  { %14 = vsyncpa [#allocation7], 0  ;;  %s25_s23 = sshll.u32 %s601_s3, 4  ;;  %s459_s24 = smov [#allocation2]   ;;  %s26_s23 = int_to_ptr.hbm [resolvable:$true] %s25_s23 }
   0x3   :  { %s27_s25 = sshll.u32 %s459_s24, 4  ;;  %s460_s26 = smov 256   ;;  %s28_s25 = int_to_ptr.vmem [resolvable:$true] %s27_s25 }
   0x4   :  { %s461_s27 = smov 16  }
   0x5   :  { %33 = dma.hbm_to_vmem [thread:$0]  %s26_s23, 4096, %s28_s25, [#allocation3], %s460_s26, %s460_s26, %s461_s27  }
   0x6   :  { %453 = dma.done.wait [#allocation3], 4096  }
   0x7   :  { %454 = vsyncadd [#allocation3], 4294963200  ;;  %vm53_vm0 = vcmask 64512   ;;  %v48_v0 = vld [vmem:[%s599_s1] sm:$0xff]  ;;  %v41_v2 = vld [vmem:[%s598_s0 + $0x8] sm:$0xff]  ;;  %s285_s25 = sshll.u32 %s603_s5, 4  ;;  %s286_s25 = int_to_ptr.hbm [resolvable:$true] %s285_s25 }
   0x8   :  { %v40_v1 = vld [vmem:[%s598_s0] sm:$0xff]  ;;  %93 = vmatpush.msra.mxu0 %v48_v0  ;;  %v42_v3 = vld [vmem:[%s598_s0 + $0x10] sm:$0xff]  ;;  %v43_v4 = vld [vmem:[%s598_s0 + $0x18] sm:$0xff]  ;;  %s464_s26 = smov 128   ;;  %s465_s27 = smov 8  }
   0x9   :  { %316 = vmatmul.msk.f32.vlgmr.msra.gmra.mxu0 %vm53_vm0, %v40_v1  ;;  %v157_v5 = vld [vmem:[#allocation2 + $0xf0] sm:$0xff]  ;;  %v524_v6 = vld [vmem:[#allocation2 + $0xf8] sm:$0xff]  ;;  %v155_v7 = vld [vmem:[#allocation2 + $0xe0] sm:$0xff]  ;;  %s466_s28 = smov [#allocation6]   ;;  %s298_s7 = sshll.u32 %s604_s6, 4  ;;  %s299_s7 = int_to_ptr.hbm [resolvable:$true] %s298_s7 }
   0xa   :  { %165 = vmatpush.msra.mxu1 %v157_v5  ;;  %206 = vmatpush.msra.mxu2 %v524_v6  ;;  %v527_v8 = vld [vmem:[#allocation2 + $0xe8] sm:$0xff]  ;;  %v153_v9 = vld [vmem:[#allocation2 + $0xd0] sm:$0xff]  ;;  %v529_v10 = vld [vmem:[#allocation2 + $0xd8] sm:$0xff]  ;;  %s296_s29 = sshll.u32 %s466_s28, 4  ;;  %s297_s29 = int_to_ptr.vmem [resolvable:$true] %s296_s29 }
   0xb   :  { %324 = vmatpush.msra.mxu3 %v157_v5  ;;  %v151_v11 = vld [vmem:[#allocation2 + $0xc0] sm:$0xff]  ;;  %v532_v12 = vld [vmem:[#allocation2 + $0xc8] sm:$0xff]  ;;  %v149_v14 = vld [vmem:[#allocation2 + $0xb0] sm:$0xff] }
   0xc   :  { %166 = vmatpush.msra.mxu1 %v155_v7  ;;  %207 = vmatpush.msra.mxu2 %v527_v8  ;;  %v44_v13 = vld [vmem:[%s598_s0 + $0x20] sm:$0xff]  ;;  %v538_v15 = vld [vmem:[#allocation2 + $0xb8] sm:$0xff]  ;;  %v542_v17 = vld [vmem:[#allocation2 + $0xa8] sm:$0xff] }
   0xd   :  { %325 = vmatpush.msra.mxu3 %v155_v7  ;;  %v147_v16 = vld [vmem:[#allocation2 + $0xa0] sm:$0xff]  ;;  %v145_v18 = vld [vmem:[#allocation2 + $0x90] sm:$0xff]  ;;  %v545_v19 = vld [vmem:[#allocation2 + $0x98] sm:$0xff] }
   0xe   :  { %167 = vmatpush.msra.mxu1 %v153_v9  ;;  %208 = vmatpush.msra.mxu2 %v529_v10  ;;  %v143_v20 = vld [vmem:[#allocation2 + $0x80] sm:$0xff]  ;;  %v144_v21 = vld [vmem:[#allocation2 + $0x88] sm:$0xff]  ;;  %v141_v23 = vld [vmem:[#allocation2 + $0x70] sm:$0xff] }
   0xf   :  { %326 = vmatpush.msra.mxu3 %v153_v9  ;;  %v45_v22 = vld [vmem:[%s598_s0 + $0x28] sm:$0xff]  ;;  %v142_v24 = vld [vmem:[#allocation2 + $0x78] sm:$0xff]  ;;  %v139_v25 = vld [vmem:[#allocation2 + $0x60] sm:$0xff] }
  0x10   :  { %168 = vmatpush.msra.mxu1 %v151_v11  ;;  %209 = vmatpush.msra.mxu2 %v532_v12  ;;  %v140_v26 = vld [vmem:[#allocation2 + $0x68] sm:$0xff]  ;;  %v137_v27 = vld [vmem:[#allocation2 + $0x50] sm:$0xff]  ;;  %v138_v28 = vld [vmem:[#allocation2 + $0x58] sm:$0xff] }
  0x11   :  { %317 = vmatmul.msk.f32.gmra.mxu0 %vm53_vm0, %v41_v2  ;;  %327 = vmatpush.msra.mxu3 %v151_v11  ;;  %v46_v29 = vld [vmem:[%s598_s0 + $0x30] sm:$0xff]  ;;  %v47_v30 = vld [vmem:[%s598_s0 + $0x38] sm:$0xff]  ;;  %v135_v31 = vld [vmem:[#allocation2 + $0x40] sm:$0xff]  ;;  %v462_v11 = vmov 0  }
  0x12   :  { %169 = vmatpush.msra.mxu1 %v149_v14  ;;  %210 = vmatpush.msra.mxu2 %v538_v15  ;;  %v136_v32 = vld [vmem:[#allocation2 + $0x48] sm:$0xff]  ;;  %v133_v33 = vld [vmem:[#allocation2 + $0x30] sm:$0xff]  ;;  %v134_v34 = vld [vmem:[#allocation2 + $0x38] sm:$0xff] }
  0x13   :  { %328 = vmatpush.msra.mxu3 %v149_v14  ;;  %v131_v35 = vld [vmem:[#allocation2 + $0x20] sm:$0xff]  ;;  %v132_v36 = vld [vmem:[#allocation2 + $0x28] sm:$0xff]  ;;  %v129_v37 = vld [vmem:[#allocation2 + $0x10] sm:$0xff] }
  0x14   :  { %170 = vmatpush.msra.mxu1 %v147_v16  ;;  %211 = vmatpush.msra.mxu2 %v542_v17  ;;  %v130_v38 = vld [vmem:[#allocation2 + $0x18] sm:$0xff]  ;;  %v127_v39 = vld [vmem:[#allocation2] sm:$0xff]  ;;  %v128_v40 = vld [vmem:[#allocation2 + $0x8] sm:$0xff] }
  0x15   :  { %329 = vmatpush.msra.mxu3 %v147_v16  ;;  %v364_v41 = vld [vmem:[%s600_s2] ss:$0 sm:$0xff] }
  0x16   :  { %171 = vmatpush.msra.mxu1 %v145_v18  ;;  %212 = vmatpush.msra.mxu2 %v545_v19  ;;  %v159_v2 = vld [vmem:[%s602_s4] sm:$0x3]  ;;  %s463_s4 = smov [#allocation5]  }
  0x17   :  { %330 = vmatpush.msra.mxu3 %v145_v18  ;;  %s283_s22 = sshll.u32 %s463_s4, 4  ;;  %s284_s22 = int_to_ptr.vmem [resolvable:$true] %s283_s22 }
  0x18   :  { %172 = vmatpush.msra.mxu1 %v143_v20  ;;  %213 = vmatpush.msra.mxu2 %v144_v21 }
  0x19   :  { %318 = vmatmul.msk.f32.gmra.mxu0 %vm53_vm0, %v42_v3  ;;  %331 = vmatpush.msra.mxu3 %v143_v20  ;;  %v161_v3 = vperm.slane %v159_v2, 0 }
  0x1a   :  { %173 = vmatpush.msra.mxu1 %v141_v23  ;;  %214 = vmatpush.msra.mxu2 %v142_v24 }
  0x1b   :  { %332 = vmatpush.msra.mxu3 %v141_v23 }
  0x1c   :  { %174 = vmatpush.msra.mxu1 %v139_v25  ;;  %215 = vmatpush.msra.mxu2 %v140_v26 }
  0x1d   :  { %333 = vmatpush.msra.mxu3 %v139_v25 }
  0x1e   :  { %175 = vmatpush.msra.mxu1 %v137_v27  ;;  %216 = vmatpush.msra.mxu2 %v138_v28 }
  0x1f   :  { %334 = vmatpush.msra.mxu3 %v137_v27 }
  0x20   :  { %176 = vmatpush.msra.mxu1 %v135_v31  ;;  %217 = vmatpush.msra.mxu2 %v136_v32 }
  0x21   :  { %319 = vmatmul.msk.f32.gmra.mxu0 %vm53_vm0, %v43_v4  ;;  %335 = vmatpush.msra.mxu3 %v135_v31 }
  0x22   :  { %177 = vmatpush.msra.mxu1 %v133_v33  ;;  %218 = vmatpush.msra.mxu2 %v134_v34 }
  0x23   :  { %336 = vmatpush.msra.mxu3 %v133_v33 }
  0x24   :  { %178 = vmatpush.msra.mxu1 %v131_v35  ;;  %219 = vmatpush.msra.mxu2 %v132_v36 }
  0x25   :  { %337 = vmatpush.msra.mxu3 %v131_v35 }
  0x26   :  { %179 = vmatpush.msra.mxu1 %v129_v37  ;;  %220 = vmatpush.msra.mxu2 %v130_v38 }
  0x27   :  { %338 = vmatpush.msra.mxu3 %v129_v37 }
  0x28   :  { %180 = vmatpush.msra.mxu1 %v127_v39  ;;  %221 = vmatpush.msra.mxu2 %v128_v40 }
  0x29   :  { %320 = vmatmul.msk.f32.gmra.mxu0 %vm53_vm0, %v44_v13  ;;  %339 = vmatpush.msra.mxu3 %v127_v39 }
  0x2b   :  { %340 = vmatpush.msrb.mxu3 %v524_v6  ;;  %v574_v6 = vperm.slane %v159_v2, 1 }
  0x2d   :  { %341 = vmatpush.msrb.mxu3 %v527_v8 }
  0x2f   :  { %342 = vmatpush.msrb.mxu3 %v529_v10 }
  0x31   :  { %321 = vmatmul.msk.f32.gmra.mxu0 %vm53_vm0, %v45_v22  ;;  %343 = vmatpush.msrb.mxu3 %v532_v12 }
  0x33   :  { %344 = vmatpush.msrb.mxu3 %v538_v15 }
  0x35   :  { %345 = vmatpush.msrb.mxu3 %v542_v17 }
  0x37   :  { %346 = vmatpush.msrb.mxu3 %v545_v19 }
  0x39   :  { %322 = vmatmul.msk.f32.gmra.mxu0 %vm53_vm0, %v46_v29  ;;  %347 = vmatpush.msrb.mxu3 %v144_v21 }
  0x3b   :  { %348 = vmatpush.msrb.mxu3 %v142_v24 }
  0x3d   :  { %349 = vmatpush.msrb.mxu3 %v140_v26 }
  0x3f   :  { %350 = vmatpush.msrb.mxu3 %v138_v28 }
  0x41   :  { %323 = vmatmul.msk.f32.gmra.mxu0 %vm53_vm0, %v47_v30  ;;  %351 = vmatpush.msrb.mxu3 %v136_v32 }
  0x43   :  { %352 = vmatpush.msrb.mxu3 %v134_v34 }
  0x45   :  { %353 = vmatpush.msrb.mxu3 %v132_v36 }
  0x47   :  { %354 = vmatpush.msrb.mxu3 %v130_v38 }
  0x49   :  { %355 = vmatpush.msrb.mxu3 %v128_v40 }
  0x86   :  { %v95_v42 = vpop.f32.mrf.mxu0 }
  0x87   :  { %v96_v43 = vadd.f32 %v364_v41, %v95_v42 }
  0x89   :  { %365 = vtanh.f32 %v96_v43 }
  0x8e   :  { %v98_v44 = vpop.f32.mrf.mxu0 }
  0x8f   :  { %v366_v45 = vpop.eup %365  ;;  %v99_v46 = vadd.f32 %v364_v41, %v98_v44 }
  0x90   :  { %181 = vmatmul.f32.vlgmr.msra.gmra.mxu1 %v366_v45  ;;  %222 = vmatmul.f32.vlgmr.msra.gmra.mxu2 %v366_v45 }
  0x91   :  { %367 = vtanh.f32 %v99_v46 }
  0x96   :  { %v101_v47 = vpop.f32.mrf.mxu0 }
  0x97   :  { %v368_v48 = vpop.eup %367  ;;  %v102_v49 = vadd.f32 %v364_v41, %v101_v47 }
  0x98   :  { %184 = vmatmul.f32.gmra.mxu1 %v368_v48  ;;  %225 = vmatmul.f32.gmra.mxu2 %v368_v48 }
  0x99   :  { %369 = vtanh.f32 %v102_v49 }
  0x9e   :  { %v104_v50 = vpop.f32.mrf.mxu0 }
  0x9f   :  { %v370_v51 = vpop.eup %369  ;;  %v105_v52 = vadd.f32 %v364_v41, %v104_v50 }
  0xa0   :  { %187 = vmatmul.f32.gmra.mxu1 %v370_v51  ;;  %228 = vmatmul.f32.gmra.mxu2 %v370_v51 }
  0xa1   :  { %371 = vtanh.f32 %v105_v52 }
  0xa6   :  { %v107_v53 = vpop.f32.mrf.mxu0 }
  0xa7   :  { %v372_v54 = vpop.eup %371  ;;  %v108_v55 = vadd.f32 %v364_v41, %v107_v53 }
  0xa8   :  { %190 = vmatmul.f32.gmra.mxu1 %v372_v54  ;;  %231 = vmatmul.f32.gmra.mxu2 %v372_v54 }
  0xa9   :  { %373 = vtanh.f32 %v108_v55 }
  0xae   :  { %v110_v56 = vpop.f32.mrf.mxu0 }
  0xaf   :  { %v374_v57 = vpop.eup %373  ;;  %v111_v58 = vadd.f32 %v364_v41, %v110_v56 }
  0xb0   :  { %193 = vmatmul.f32.gmra.mxu1 %v374_v57  ;;  %234 = vmatmul.f32.gmra.mxu2 %v374_v57 }
  0xb1   :  { %375 = vtanh.f32 %v111_v58 }
  0xb6   :  { %v113_v59 = vpop.f32.mrf.mxu0 }
  0xb7   :  { %v376_v60 = vpop.eup %375  ;;  %v114_v61 = vadd.f32 %v364_v41, %v113_v59 }
  0xb8   :  { %196 = vmatmul.f32.vlgmr.msra.gmra.mxu3 %v376_v60  ;;  %237 = vmatmul.f32.gmra.mxu2 %v376_v60 }
  0xb9   :  { %377 = vtanh.f32 %v114_v61 }
  0xbe   :  { %v116_v62 = vpop.f32.mrf.mxu0 }
  0xbf   :  { %v378_v63 = vpop.eup %377  ;;  %v117_v0 = vadd.f32 %v364_v41, %v116_v62 }
  0xc0   :  { %199 = vmatmul.f32.gmra.mxu3 %v378_v63 }
  0xc1   :  { %379 = vtanh.f32 %v117_v0 }
  0xc7   :  { %v380_v1 = vpop.eup %379 }
  0xc8   :  { %202 = vmatmul.f32.gmra.mxu3 %v380_v1 }
  0xd0   :  { %240 = vmatmul.f32.vlgmr.msrb.gmra.mxu3 %v378_v63 }
  0xd8   :  { %243 = vmatmul.f32.gmra.mxu3 %v380_v1 }
 0x10d   :  { %v182_v4 = vpop.f32.mrf.mxu1 }
 0x10e   :  { %v183_v5 = vadd.f32 %v182_v4, %v161_v3 }
 0x110   :  { %247 = vst [vmem:[#allocation5] sm:$0xff] %v183_v5 }
 0x113   :  { %v223_v7 = vpop.f32.mrf.mxu2 }
 0x114   :  { %v224_v8 = vadd.f32 %v223_v7, %v574_v6 }
 0x115   :  { %v185_v9 = vpop.f32.mrf.mxu1 }
 0x116   :  { %vm255_vm1 = vcmp.gt.f32.partialorder %v224_v8, 0.0  ;;  %v186_v10 = vadd.f32 %v185_v9, %v161_v3 }
 0x117   :  { %v263_v12 = vsel %vm255_vm1, 1, %v462_v11 }
 0x118   :  { %271 = vst [vmem:[#allocation6] sm:$0xff] %v263_v12 }
 0x119   :  { %248 = vst [vmem:[#allocation5 + $0x8] sm:$0xff] %v186_v10 }
 0x11b   :  { %v226_v13 = vpop.f32.mrf.mxu2 }
 0x11c   :  { %v227_v14 = vadd.f32 %v226_v13, %v574_v6 }
 0x11d   :  { %v188_v15 = vpop.f32.mrf.mxu1 }
 0x11e   :  { %vm256_vm2 = vcmp.gt.f32.partialorder %v227_v14, 0.0  ;;  %v189_v16 = vadd.f32 %v188_v15, %v161_v3 }
 0x11f   :  { %v264_v17 = vsel %vm256_vm2, 1, %v462_v11 }
 0x120   :  { %272 = vst [vmem:[#allocation6 + $0x8] sm:$0xff] %v264_v17 }
 0x121   :  { %249 = vst [vmem:[#allocation5 + $0x10] sm:$0xff] %v189_v16 }
 0x123   :  { %v229_v18 = vpop.f32.mrf.mxu2 }
 0x124   :  { %v230_v19 = vadd.f32 %v229_v18, %v574_v6 }
 0x125   :  { %v191_v20 = vpop.f32.mrf.mxu1 }
 0x126   :  { %vm257_vm3 = vcmp.gt.f32.partialorder %v230_v19, 0.0  ;;  %v192_v21 = vadd.f32 %v191_v20, %v161_v3 }
 0x127   :  { %v265_v22 = vsel %vm257_vm3, 1, %v462_v11 }
 0x128   :  { %273 = vst [vmem:[#allocation6 + $0x10] sm:$0xff] %v265_v22 }
 0x129   :  { %250 = vst [vmem:[#allocation5 + $0x18] sm:$0xff] %v192_v21 }
 0x12b   :  { %v232_v23 = vpop.f32.mrf.mxu2 }
 0x12c   :  { %v233_v24 = vadd.f32 %v232_v23, %v574_v6 }
 0x12d   :  { %v194_v25 = vpop.f32.mrf.mxu1 }
 0x12e   :  { %vm258_vm4 = vcmp.gt.f32.partialorder %v233_v24, 0.0  ;;  %v195_v26 = vadd.f32 %v194_v25, %v161_v3 }
 0x12f   :  { %v266_v27 = vsel %vm258_vm4, 1, %v462_v11 }
 0x130   :  { %274 = vst [vmem:[#allocation6 + $0x18] sm:$0xff] %v266_v27 }
 0x131   :  { %251 = vst [vmem:[#allocation5 + $0x20] sm:$0xff] %v195_v26 }
 0x133   :  { %v235_v28 = vpop.f32.mrf.mxu2 }
 0x134   :  { %v236_v29 = vadd.f32 %v235_v28, %v574_v6 }
 0x136   :  { %vm259_vm5 = vcmp.gt.f32.partialorder %v236_v29, 0.0 }
 0x137   :  { %v267_v30 = vsel %vm259_vm5, 1, %v462_v11 }
 0x138   :  { %275 = vst [vmem:[#allocation6 + $0x20] sm:$0xff] %v267_v30 }
 0x13b   :  { %v197_v31 = vpop.f32.mrf.mxu3  ;;  %v238_v32 = vpop.f32.mrf.mxu2 }
 0x13c   :  { %v198_v33 = vadd.f32 %v197_v31, %v161_v3  ;;  %v239_v34 = vadd.f32 %v238_v32, %v574_v6 }
 0x13e   :  { %252 = vst [vmem:[#allocation5 + $0x28] sm:$0xff] %v198_v33  ;;  %vm260_vm6 = vcmp.gt.f32.partialorder %v239_v34, 0.0 }
 0x13f   :  { %v268_v35 = vsel %vm260_vm6, 1, %v462_v11 }
 0x140   :  { %276 = vst [vmem:[#allocation6 + $0x28] sm:$0xff] %v268_v35 }
 0x143   :  { %v200_v36 = vpop.f32.mrf.mxu3 }
 0x144   :  { %v201_v37 = vadd.f32 %v200_v36, %v161_v3 }
 0x146   :  { %253 = vst [vmem:[#allocation5 + $0x30] sm:$0xff] %v201_v37 }
 0x14b   :  { %v203_v38 = vpop.f32.mrf.mxu3 }
 0x14c   :  { %v204_v39 = vadd.f32 %v203_v38, %v161_v3 }
 0x14e   :  { %254 = vst [vmem:[#allocation5 + $0x38] sm:$0xff] %v204_v39 }
 0x14f   :  { %291 = dma.vmem_to_hbm [thread:$0]  %s284_s22, 1024, %s286_s25, [#allocation4], %s464_s26, %s464_s26, %s465_s27  }
 0x153   :  { %v241_v40 = vpop.f32.mrf.mxu3 }
 0x154   :  { %v242_v41 = vadd.f32 %v241_v40, %v574_v6 }
 0x156   :  { %vm261_vm7 = vcmp.gt.f32.partialorder %v242_v41, 0.0 }
 0x157   :  { %v269_v42 = vsel %vm261_vm7, 1, %v462_v11 }
 0x158   :  { %277 = vst [vmem:[#allocation6 + $0x30] sm:$0xff] %v269_v42 }
 0x15b   :  { %v244_v43 = vpop.f32.mrf.mxu3 }
 0x15c   :  { %v245_v44 = vadd.f32 %v244_v43, %v574_v6 }
 0x15e   :  { %vm262_vm8 = vcmp.gt.f32.partialorder %v245_v44, 0.0 }
 0x15f   :  { %v270_v45 = vsel %vm262_vm8, 1, %v462_v11 }
 0x160   :  { %278 = vst [vmem:[#allocation6 + $0x38] sm:$0xff] %v270_v45 }
 0x161   :  { %304 = dma.vmem_to_hbm [thread:$0]  %s297_s29, 1024, %s299_s7, [#allocation7], %s464_s26, %s464_s26, %s465_s27  }
 0x162   :  { %455 = dma.done.wait [#allocation4], 1024  }
 0x163   :  { %456 = vsyncadd [#allocation4], 4294966272 }
 0x164   :  { %457 = dma.done.wait [#allocation7], 1024  }
 0x165   :  { %458 = vsyncadd [#allocation7], 4294966272 }
 0x166   :  { %313 = vsyncpa [#allocation3], 1 }
 0x167   :  { %314 = vsyncpa [#allocation4], 1 }
 0x168   :  { %315 = vsyncpa [#allocation7], 1 }

</bundles_post_ra>
